<compile_context>
chip_gen: v7x
topology: tpu7x:2x2x1
jax: 0.10.0
libtpu: 0.0.40
codegen_flags: <defaults>
</compile_context>

<pallas_src>
import numpy as np

import jax
import jax.numpy as jnp
from jax import lax
from jax.experimental import pallas as pl
from jax.experimental.pallas import tpu as pltpu

# ----------------------------- model config ---------------------------------
F = 8            # samples per frame (feature-extraction frame size)
T = 8            # frames per chunk
SIGNAL_LEN = T * F
D = 32           # hidden dim
L = 8            # attention K/V cache length (kernel assumes L == T, pow2)
K = 3            # depthwise temporal conv kernel size
V = 16           # output (vocab) dim
DUMMY_BATCH_SIZE = 5
DUMMY_AUDIO_RANGE_MAX = 32767
DUMMY_AUDIO_RANGE_MIN = -32767

assert T == L and (T & (T - 1)) == 0, "kernel assumes L == T and T a power of two"
_NEG_INF = -1e30

# fused-state layout (matches ModelToExport: mhsa_len first, then sub-states)
_STATE_SIZES = [1, L * D, L * D, (K - 1) * D, D]
_STATE_PLACE = [(sum(_STATE_SIZES[:i]), sum(_STATE_SIZES[:i + 1]))
                for i in range(len(_STATE_SIZES))]
TOTAL_STATE = _STATE_PLACE[-1][1]


def _ru8(n):
    return (n + 7) & ~7


# ------------------------- packed weight-slab layout -------------------------
_W_FEAT = 0                       # (F, D)  w_feat * 1/32767
_B_FEAT = _ru8(_W_FEAT + F)       # (1, D)
_W_Q = _ru8(_B_FEAT + 1)          # (D, D)  w_q * 1/sqrt(D)
_W_K = _W_Q + D                   # (D, D)
_W_V = _W_K + D                   # (D, D)
_W_CONV = _W_V + D                # (K, D)
_W_DEC = _ru8(_W_CONV + K)        # (D, D)
_W_OUT = _W_DEC + D               # (D, D)  w_out zero-padded from V to D lanes
_B_OUT = _W_OUT + D               # (1, D)  b_out zero-padded
_W_ROWS = _ru8(_B_OUT + 1)        # 192


def _out_layout(B):
    """Row offsets inside the single packed f32 output slab."""
    BT, BL, CC = B * T, B * L, B * (K - 1)
    res0 = 0
    k0 = BT
    v0 = BT + BL
    c0 = BT + 2 * BL
    d0 = _ru8(c0 + CC)            # keep decoder section 8-row aligned
    return res0, k0, v0, c0, d0, d0 + B


# ------------------------------- kernel -------------------------------------
def tone_step_kernel(frames_ref,   # (BT, F)            int32
                     state_ref,    # (2*BL+CC+B, D)     f32   [K | V | conv | dec]
                     bias_ref,     # (BT, BL+BT)        f32   additive attn bias
                     w_ref,        # (_W_ROWS, D)       f32   packed dense weights
                     sel_ref,      # (sel_rows, BT+CC)  f32   conv/pool selections
                     out_ref):     # (out_rows, D)      f32   packed outputs
    BT = frames_ref.shape[0]
    B = BT // T
    BL = B * L
    CC = B * (K - 1)

    # ---- feature projection (1/32767 folded into the weight) ----------------
    frames = frames_ref[...].astype(jnp.float32)                           # (BT, F)
    feat = (jnp.dot(frames, w_ref[_W_FEAT:_W_FEAT + F, :],
                    preferred_element_type=jnp.float32)
            + w_ref[_B_FEAT:_B_FEAT + 1, :])                               # (BT, D)

    # ---- Q/K/V as three small dots (MXU idle; no lane-unaligned slices) -----
    q = jnp.dot(feat, w_ref[_W_Q:_W_Q + D, :],
                preferred_element_type=jnp.float32)                        # scaled
    k_new = jnp.dot(feat, w_ref[_W_K:_W_K + D, :],
                    preferred_element_type=jnp.float32)
    v_new = jnp.dot(feat, w_ref[_W_V:_W_V + D, :],
                    preferred_element_type=jnp.float32)

    # ---- merged streaming attention over [cache ; new] ----------------------
    k_all = jnp.concatenate([state_ref[0:BL, :], k_new], axis=0)           # (BL+BT, D)
    v_all = jnp.concatenate([state_ref[BL:2 * BL, :], v_new], axis=0)
    s = lax.dot_general(q, k_all, (((1,), (1,)), ((), ())),
                        preferred_element_type=jnp.float32)                # (BT, BL+BT)
    s = s + bias_ref[...]                  # block-diag + causal + stale-cache bias
    m = s.max(axis=-1, keepdims=True)
    p = jnp.exp(s - m)
    denom = p.sum(axis=-1, keepdims=True)
    x = jnp.dot(p, v_all, preferred_element_type=jnp.float32) / denom + feat

    # ---- cached depthwise conv: one selection matmul on the idle MXU --------
    conv_cache = state_ref[2 * BL:2 * BL + CC, :]
    x_ext = jnp.concatenate([x, conv_cache], axis=0)                       # (BT+CC, D)
    n_sel = K * BT + CC
    stacked = jnp.dot(sel_ref[0:n_sel, :], x_ext,
                      preferred_element_type=jnp.float32)   # K tap streams + next cache
    conv = (stacked[0:BT, :] * w_ref[_W_CONV:_W_CONV + 1, :] +
            stacked[BT:2 * BT, :] * w_ref[_W_CONV + 1:_W_CONV + 2, :] +
            stacked[2 * BT:3 * BT, :] * w_ref[_W_CONV + 2:_W_CONV + 3, :])
    y = jnp.tanh(conv) + x                                                 # (BT, D)
    conv_next = stacked[K * BT:K * BT + CC, :]                             # (CC, D)

    # ---- per-batch mean pooling (selection matmul) + decoder update ---------
    pool0 = _ru8(K * BT + CC)
    pooled = jnp.dot(sel_ref[pool0:pool0 + B, 0:BT], y,
                     preferred_element_type=jnp.float32)                   # (B, D)
    dec_state = state_ref[2 * BL + CC:2 * BL + CC + B, :]
    dec_next = jnp.tanh(jnp.dot(pooled, w_ref[_W_DEC:_W_DEC + D, :],
                                preferred_element_type=jnp.float32) + dec_state)

    # ---- output head (w_out zero-padded to D lanes) --------------------------
    res = (jnp.dot(y, w_ref[_W_OUT:_W_OUT + D, :],
                   preferred_element_type=jnp.float32)
           + w_ref[_B_OUT:_B_OUT + 1, :])                                  # (BT, D)

    # ---- single packed output slab (one writeback DMA) ----------------------
    _, k0, v0, c0, d0, _ = _out_layout(B)
    out_ref[0:BT, :] = res
    out_ref[k0:k0 + BL, :] = k_new       # L == T: cache fully replaced every step
    out_ref[v0:v0 + BL, :] = v_new
    out_ref[c0:c0 + CC, :] = conv_next
    out_ref[d0:d0 + B, :] = dec_next


def tone_step(params, frames, state_slab, bias):
    BT = frames.shape[0]
    B = BT // T
    out_rows = _out_layout(B)[-1]

    full = lambda shape: pl.BlockSpec(shape, lambda i: (0,) * len(shape))
    grid_spec = pltpu.PrefetchScalarGridSpec(
        num_scalar_prefetch=0,
        grid=(1,),
        in_specs=[
            full(frames.shape),            # int32 frames
            full(state_slab.shape),        # fused state slab
            full(bias.shape),              # additive attention bias
            full(params["w_slab"].shape),  # packed dense weights
            full(params["sel_slab"].shape),
        ],
        out_specs=full((out_rows, D)),     # single packed output slab
    )
    return pl.pallas_call(
        tone_step_kernel,
        grid_spec=grid_spec,
        out_shape=jax.ShapeDtypeStruct((out_rows, D), jnp.float32),
        compiler_params=pltpu.CompilerParams(dimension_semantics=("arbitrary",)),
    )(frames, state_slab, bias, params["w_slab"], params["sel_slab"])


# ------------------------- static constant builders --------------------------
def _build_sel_slab(B):
    """Selection matrices: K conv tap streams, next conv cache, mean pooling."""
    BT, CC = B * T, B * (K - 1)
    x_ext_rows = BT + CC                      # [x (BT) ; conv_cache (CC)]
    pool0 = _ru8(K * BT + CC)
    sel = np.zeros((pool0 + B, x_ext_rows), np.float32)
    for b in range(B):
        for t in range(T):
            for k in range(K):
                src = t + k                   # index into [cache_b ; x_b]
                if src < K - 1:
                    col = BT + b * (K - 1) + src
                else:
                    col = b * T + (src - (K - 1))
                sel[k * BT + b * T + t, col] = 1.0
        for j in range(K - 1):                # next conv cache = last K-1 rows of x_b
            sel[K * BT + b * (K - 1) + j, b * T + (T - (K - 1)) + j] = 1.0
        sel[pool0 + b, b * T:(b + 1) * T] = 1.0 / T
    return sel


def _build_struct_bias(B):
    """Static additive attention bias: block-diag across batch + causal new half."""
    BT, BL = B * T, B * L
    rows = np.arange(BT)
    r_b, r_pos = rows // T, rows % T
    c_b_cache = np.arange(BL) // L
    ok_cache = r_b[:, None] == c_b_cache[None, :]
    n_b, n_pos = np.arange(BT) // T, np.arange(BT) % T
    ok_new = (r_b[:, None] == n_b[None, :]) & (n_pos[None, :] <= r_pos[:, None])
    ok = np.concatenate([ok_cache, ok_new], axis=1)
    return np.where(ok, 0.0, _NEG_INF).astype(np.float32)


# ---------------------------- glue / wrapper ---------------------------------
def init_params(key, batch_size=DUMMY_BATCH_SIZE):
    ks = jax.random.split(key, 8)
    s = 0.1
    w_feat = (jax.random.normal(ks[0], (F, D)) * s).astype(jnp.float32) / 32767.0
    b_feat = jnp.zeros((1, D), jnp.float32)
    w_q = (jax.random.normal(ks[1], (D, D)) * s).astype(jnp.float32) / (D ** 0.5)
    w_k = (jax.random.normal(ks[2], (D, D)) * s).astype(jnp.float32)
    w_v = (jax.random.normal(ks[3], (D, D)) * s).astype(jnp.float32)
    w_conv = (jax.random.normal(ks[4], (K, D)) * s).astype(jnp.float32)
    w_dec = (jax.random.normal(ks[5], (D, D)) * s).astype(jnp.float32)
    w_out = (jax.random.normal(ks[6], (D, V)) * s).astype(jnp.float32)
    b_out = jnp.zeros((1, V), jnp.float32)

    w_slab = jnp.zeros((_W_ROWS, D), jnp.float32)
    w_slab = w_slab.at[_W_FEAT:_W_FEAT + F].set(w_feat)
    w_slab = w_slab.at[_B_FEAT:_B_FEAT + 1].set(b_feat)
    w_slab = w_slab.at[_W_Q:_W_Q + D].set(w_q)
    w_slab = w_slab.at[_W_K:_W_K + D].set(w_k)
    w_slab = w_slab.at[_W_V:_W_V + D].set(w_v)
    w_slab = w_slab.at[_W_CONV:_W_CONV + K].set(w_conv)
    w_slab = w_slab.at[_W_DEC:_W_DEC + D].set(w_dec)
    w_slab = w_slab.at[_W_OUT:_W_OUT + D].set(jnp.pad(w_out, ((0, 0), (0, D - V))))
    w_slab = w_slab.at[_B_OUT:_B_OUT + 1].set(jnp.pad(b_out, ((0, 0), (0, D - V))))

    return {
        "w_slab": w_slab,
        "sel_slab": jnp.asarray(_build_sel_slab(batch_size)),
        "attn_bias_struct": jnp.asarray(_build_struct_bias(batch_size)),
    }


def get_initial_state(batch_size):
    """Zero fused state, float16, shape (batch, TOTAL_STATE) — as in PyTorch."""
    return jnp.zeros((batch_size, TOTAL_STATE), jnp.float16)


@jax.jit
def forward(params, signal, state):
    """signal: (B, SIGNAL_LEN, 1) int32; state: (B, TOTAL_STATE) float16."""
    B = signal.shape[0]
    BT, BL, CC = B * T, B * L, B * (K - 1)

    s32 = state.astype(jnp.float32)
    p = _STATE_PLACE
    mhsa_len = s32[:, p[0][0]:p[0][1]]                                  # (B, 1)
    k_cache = s32[:, p[1][0]:p[1][1]].reshape(BL, D)
    v_cache = s32[:, p[2][0]:p[2][1]].reshape(BL, D)
    conv_cache = s32[:, p[3][0]:p[3][1]].reshape(CC, D)
    dec_state = s32[:, p[4][0]:p[4][1]]                                 # (B, D)

    # ONE fused f32 state slab (row offsets 0 / BL / 2BL / 2BL+CC).
    state_slab = jnp.concatenate([k_cache, v_cache, conv_cache, dec_state], axis=0)

    # lens-dependent stale-cache bias (tiny XLA ops) + static structural bias.
    lens = jnp.clip(mhsa_len[:, 0], 0.0, float(L))                      # (B,)
    col_pos = np.tile(np.arange(L, dtype=np.float32), B)                # constant
    cache_ok = col_pos >= (float(L) - jnp.repeat(lens, L))              # (BL,)
    lens_bias = jnp.where(cache_ok, 0.0, _NEG_INF)
    bias = params["attn_bias_struct"] + jnp.concatenate(
        [lens_bias, jnp.zeros((BT,), jnp.float32)])[None, :]            # (BT, BL+BT)

    frames = signal.reshape(BT, F)                                      # int32

    out = tone_step(params, frames, state_slab, bias)                   # packed slab

    res0, k0, v0, c0, d0, _ = _out_layout(B)
    res = out[res0:res0 + BT, 0:V]
    k_n = out[k0:k0 + BL]
    v_n = out[v0:v0 + BL]
    c_n = out[c0:c0 + CC]
    d_n = out[d0:d0 + B]

    # mhsa_len update is pure arithmetic on the old length.
    len_next = jnp.minimum(mhsa_len + float(T), float(L))               # (B, 1)

    # repack in the ModelToExport layout: len, K, V, conv, dec
    new_state = jnp.concatenate(
        [len_next,
         k_n.reshape(B, L * D),
         v_n.reshape(B, L * D),
         c_n.reshape(B, (K - 1) * D),
         d_n], axis=-1).astype(jnp.float16)
    return res.reshape(B, T, V).astype(jnp.float16), new_state


# --------------------------------- main --------------------------------------
if __name__ == "__main__":
    key = jax.random.PRNGKey(0)
    pkey, skey = jax.random.split(key)
    params = init_params(pkey, DUMMY_BATCH_SIZE)

    signal = jax.random.randint(
        skey, (DUMMY_BATCH_SIZE, SIGNAL_LEN, 1),
        DUMMY_AUDIO_RANGE_MIN, DUMMY_AUDIO_RANGE_MAX + 1, dtype=jnp.int32)
    state0 = get_initial_state(DUMMY_BATCH_SIZE)

    # two streaming steps: the second exercises the non-empty-cache (len > 0) path
    res1, state1 = forward(params, signal, state0)
    res2, state2 = forward(params, signal, state1)
    jax.block_until_ready((res1, state1, res2, state2))

    assert res1.shape == (DUMMY_BATCH_SIZE, T, V) and res1.dtype == jnp.float16
    assert state1.shape == (DUMMY_BATCH_SIZE, TOTAL_STATE) and state1.dtype == jnp.float16
    assert res2.shape == (DUMMY_BATCH_SIZE, T, V) and state2.dtype == jnp.float16
    assert bool(jnp.all(jnp.isfinite(res2.astype(jnp.float32))))
    print("KERNEL_OK")
</pallas_src>

<mosaic_0001>
module attributes {stable_mosaic.version = 11 : i64} {
  func.func @tone_step_kernel(%arg0: i32, %arg1: memref<40x8xi32, #tpu.memory_space<vmem>>, %arg2: memref<95x32xf32, #tpu.memory_space<vmem>>, %arg3: memref<40x80xf32, #tpu.memory_space<vmem>>, %arg4: memref<192x32xf32, #tpu.memory_space<vmem>>, %arg5: memref<141x50xf32, #tpu.memory_space<vmem>>, %arg6: memref<141x32xf32, #tpu.memory_space<vmem>>) attributes {dimension_semantics = [#tpu.dimension_semantics<arbitrary>], iteration_bounds = array<i64: 1>, scalar_prefetch = 0 : i64, scratch_operands = 0 : i64, tpu.core_type = #tpu.core_type<tc>, window_params = [{pipeline_mode = #tpu.pipeline_mode<synchronous>, transform_indices = @transform_0, window_bounds = array<i64: 40, 8>}, {pipeline_mode = #tpu.pipeline_mode<synchronous>, transform_indices = @transform_1, window_bounds = array<i64: 95, 32>}, {pipeline_mode = #tpu.pipeline_mode<synchronous>, transform_indices = @transform_2, window_bounds = array<i64: 40, 80>}, {pipeline_mode = #tpu.pipeline_mode<synchronous>, transform_indices = @transform_3, window_bounds = array<i64: 192, 32>}, {pipeline_mode = #tpu.pipeline_mode<synchronous>, transform_indices = @transform_4, window_bounds = array<i64: 141, 50>}, {pipeline_mode = #tpu.pipeline_mode<synchronous>, transform_indices = @transform_5, window_bounds = array<i64: 141, 32>}]} {
    %c0 = arith.constant 0 : index
    %c0_0 = arith.constant 0 : index
    %0 = vector.load %arg1[%c0, %c0_0] : memref<40x8xi32, #tpu.memory_space<vmem>>, vector<40x8xi32>
    %1 = arith.sitofp %0 : vector<40x8xi32> to vector<40x8xf32>
    %c0_1 = arith.constant 0 : index
    %c0_2 = arith.constant 0 : index
    %2 = vector.load %arg4[%c0_1, %c0_2] : memref<192x32xf32, #tpu.memory_space<vmem>>, vector<8x32xf32>
    %cst = arith.constant dense<0.000000e+00> : vector<40x32xf32>
    %3 = tpu.matmul %1, %2, %cst {dimension_numbers = #tpu.dot_dimension_numbers<[1], [0], [0], [1], [0, 0, 1, 1], [], []>} : vector<40x8xf32>, vector<8x32xf32>, vector<40x32xf32> -> vector<40x32xf32>
    %c8 = arith.constant 8 : index
    %c0_3 = arith.constant 0 : index
    %4 = vector.load %arg4[%c8, %c0_3] : memref<192x32xf32, #tpu.memory_space<vmem>>, vector<1x32xf32>
    %5 = vector.broadcast %4 : vector<1x32xf32> to vector<40x32xf32>
    %6 = arith.addf %3, %5 : vector<40x32xf32>
    %c16 = arith.constant 16 : index
    %c0_4 = arith.constant 0 : index
    %7 = vector.load %arg4[%c16, %c0_4] : memref<192x32xf32, #tpu.memory_space<vmem>>, vector<32x32xf32>
    %cst_5 = arith.constant dense<0.000000e+00> : vector<40x32xf32>
    %8 = tpu.matmul %6, %7, %cst_5 {dimension_numbers = #tpu.dot_dimension_numbers<[1], [0], [0], [1], [0, 0, 1, 1], [], []>} : vector<40x32xf32>, vector<32x32xf32>, vector<40x32xf32> -> vector<40x32xf32>
    %c48 = arith.constant 48 : index
    %c0_6 = arith.constant 0 : index
    %9 = vector.load %arg4[%c48, %c0_6] : memref<192x32xf32, #tpu.memory_space<vmem>>, vector<32x32xf32>
    %cst_7 = arith.constant dense<0.000000e+00> : vector<40x32xf32>
    %10 = tpu.matmul %6, %9, %cst_7 {dimension_numbers = #tpu.dot_dimension_numbers<[1], [0], [0], [1], [0, 0, 1, 1], [], []>} : vector<40x32xf32>, vector<32x32xf32>, vector<40x32xf32> -> vector<40x32xf32>
    %c80 = arith.constant 80 : index
    %c0_8 = arith.constant 0 : index
    %11 = vector.load %arg4[%c80, %c0_8] : memref<192x32xf32, #tpu.memory_space<vmem>>, vector<32x32xf32>
    %cst_9 = arith.constant dense<0.000000e+00> : vector<40x32xf32>
    %12 = tpu.matmul %6, %11, %cst_9 {dimension_numbers = #tpu.dot_dimension_numbers<[1], [0], [0], [1], [0, 0, 1, 1], [], []>} : vector<40x32xf32>, vector<32x32xf32>, vector<40x32xf32> -> vector<40x32xf32>
    %c0_10 = arith.constant 0 : index
    %c0_11 = arith.constant 0 : index
    %13 = vector.load %arg2[%c0_10, %c0_11] : memref<95x32xf32, #tpu.memory_space<vmem>>, vector<40x32xf32>
    %14 = tpu.concatenate %13, %10 in 0 : vector<40x32xf32>, vector<40x32xf32> -> vector<80x32xf32>
    %c40 = arith.constant 40 : index
    %c0_12 = arith.constant 0 : index
    %15 = vector.load %arg2[%c40, %c0_12] : memref<95x32xf32, #tpu.memory_space<vmem>>, vector<40x32xf32>
    %16 = tpu.concatenate %15, %12 in 0 : vector<40x32xf32>, vector<40x32xf32> -> vector<80x32xf32>
    %cst_13 = arith.constant dense<0.000000e+00> : vector<40x80xf32>
    %17 = tpu.matmul %8, %14, %cst_13 {dimension_numbers = #tpu.dot_dimension_numbers<[1], [1], [0], [0], [0, 0, 1, 0], [], []>} : vector<40x32xf32>, vector<80x32xf32>, vector<40x80xf32> -> vector<40x80xf32>
    %c0_14 = arith.constant 0 : index
    %c0_15 = arith.constant 0 : index
    %18 = vector.load %arg3[%c0_14, %c0_15] : memref<40x80xf32, #tpu.memory_space<vmem>>, vector<40x80xf32>
    %19 = arith.addf %17, %18 : vector<40x80xf32>
    %cst_16 = arith.constant dense<0xFF800000> : vector<40xf32>
    %20 = vector.multi_reduction <maximumf>, %19, %cst_16 [1] : vector<40x80xf32> to vector<40xf32>
    %21 = vector.shape_cast %20 : vector<40xf32> to vector<40x1xf32>
    %22 = vector.broadcast %21 : vector<40x1xf32> to vector<40x80xf32>
    %23 = arith.subf %19, %22 : vector<40x80xf32>
    %24 = math.exp %23 : vector<40x80xf32>
    %cst_17 = arith.constant dense<0.000000e+00> : vector<40xf32>
    %25 = vector.multi_reduction <add>, %24, %cst_17 [1] : vector<40x80xf32> to vector<40xf32>
    %26 = vector.shape_cast %25 : vector<40xf32> to vector<40x1xf32>
    %cst_18 = arith.constant dense<0.000000e+00> : vector<40x32xf32>
    %27 = tpu.matmul %24, %16, %cst_18 {dimension_numbers = #tpu.dot_dimension_numbers<[1], [0], [0], [1], [0, 0, 1, 1], [], []>} : vector<40x80xf32>, vector<80x32xf32>, vector<40x32xf32> -> vector<40x32xf32>
    %28 = vector.broadcast %26 : vector<40x1xf32> to vector<40x32xf32>
    %29 = arith.divf %27, %28 : vector<40x32xf32>
    %30 = arith.addf %29, %6 : vector<40x32xf32>
    %c80_19 = arith.constant 80 : index
    %c0_20 = arith.constant 0 : index
    %31 = vector.load %arg2[%c80_19, %c0_20] : memref<95x32xf32, #tpu.memory_space<vmem>>, vector<10x32xf32>
    %32 = tpu.concatenate %30, %31 in 0 : vector<40x32xf32>, vector<10x32xf32> -> vector<50x32xf32>
    %c0_21 = arith.constant 0 : index
    %c0_22 = arith.constant 0 : index
    %33 = vector.load %arg5[%c0_21, %c0_22] : memref<141x50xf32, #tpu.memory_space<vmem>>, vector<130x50xf32>
    %cst_23 = arith.constant dense<0.000000e+00> : vector<130x32xf32>
    %34 = tpu.matmul %33, %32, %cst_23 {dimension_numbers = #tpu.dot_dimension_numbers<[1], [0], [0], [1], [0, 0, 1, 1], [], []>} : vector<130x50xf32>, vector<50x32xf32>, vector<130x32xf32> -> vector<130x32xf32>
    %35 = vector.extract_strided_slice %34 {offsets = [0, 0], sizes = [40, 32], strides = [1, 1]} : vector<130x32xf32> to vector<40x32xf32>
    %c112 = arith.constant 112 : index
    %c0_24 = arith.constant 0 : index
    %36 = vector.load %arg4[%c112, %c0_24] : memref<192x32xf32, #tpu.memory_space<vmem>>, vector<1x32xf32>
    %37 = vector.broadcast %36 : vector<1x32xf32> to vector<40x32xf32>
    %38 = arith.mulf %35, %37 : vector<40x32xf32>
    %39 = vector.extract_strided_slice %34 {offsets = [40, 0], sizes = [40, 32], strides = [1, 1]} : vector<130x32xf32> to vector<40x32xf32>
    %c113 = arith.constant 113 : index
    %c0_25 = arith.constant 0 : index
    %40 = vector.load %arg4[%c113, %c0_25] : memref<192x32xf32, #tpu.memory_space<vmem>>, vector<1x32xf32>
    %41 = vector.broadcast %40 : vector<1x32xf32> to vector<40x32xf32>
    %42 = arith.mulf %39, %41 : vector<40x32xf32>
    %43 = arith.addf %38, %42 : vector<40x32xf32>
    %44 = vector.extract_strided_slice %34 {offsets = [80, 0], sizes = [40, 32], strides = [1, 1]} : vector<130x32xf32> to vector<40x32xf32>
    %c114 = arith.constant 114 : index
    %c0_26 = arith.constant 0 : index
    %45 = vector.load %arg4[%c114, %c0_26] : memref<192x32xf32, #tpu.memory_space<vmem>>, vector<1x32xf32>
    %46 = vector.broadcast %45 : vector<1x32xf32> to vector<40x32xf32>
    %47 = arith.mulf %44, %46 : vector<40x32xf32>
    %48 = arith.addf %43, %47 : vector<40x32xf32>
    %49 = math.tanh %48 : vector<40x32xf32>
    %50 = arith.addf %49, %30 : vector<40x32xf32>
    %51 = vector.extract_strided_slice %34 {offsets = [120, 0], sizes = [10, 32], strides = [1, 1]} : vector<130x32xf32> to vector<10x32xf32>
    %c136 = arith.constant 136 : index
    %c0_27 = arith.constant 0 : index
    %52 = vector.load %arg5[%c136, %c0_27] : memref<141x50xf32, #tpu.memory_space<vmem>>, vector<5x40xf32>
    %cst_28 = arith.constant dense<0.000000e+00> : vector<5x32xf32>
    %53 = tpu.matmul %52, %50, %cst_28 {dimension_numbers = #tpu.dot_dimension_numbers<[1], [0], [0], [1], [0, 0, 1, 1], [], []>} : vector<5x40xf32>, vector<40x32xf32>, vector<5x32xf32> -> vector<5x32xf32>
    %c90 = arith.constant 90 : index
    %c0_29 = arith.constant 0 : index
    %54 = vector.load %arg2[%c90, %c0_29] : memref<95x32xf32, #tpu.memory_space<vmem>>, vector<5x32xf32>
    %c120 = arith.constant 120 : index
    %c0_30 = arith.constant 0 : index
    %55 = vector.load %arg4[%c120, %c0_30] : memref<192x32xf32, #tpu.memory_space<vmem>>, vector<32x32xf32>
    %cst_31 = arith.constant dense<0.000000e+00> : vector<5x32xf32>
    %56 = tpu.matmul %53, %55, %cst_31 {dimension_numbers = #tpu.dot_dimension_numbers<[1], [0], [0], [1], [0, 0, 1, 1], [], []>} : vector<5x32xf32>, vector<32x32xf32>, vector<5x32xf32> -> vector<5x32xf32>
    %57 = arith.addf %56, %54 : vector<5x32xf32>
    %58 = math.tanh %57 : vector<5x32xf32>
    %c152 = arith.constant 152 : index
    %c0_32 = arith.constant 0 : index
    %59 = vector.load %arg4[%c152, %c0_32] : memref<192x32xf32, #tpu.memory_space<vmem>>, vector<32x32xf32>
    %cst_33 = arith.constant dense<0.000000e+00> : vector<40x32xf32>
    %60 = tpu.matmul %50, %59, %cst_33 {dimension_numbers = #tpu.dot_dimension_numbers<[1], [0], [0], [1], [0, 0, 1, 1], [], []>} : vector<40x32xf32>, vector<32x32xf32>, vector<40x32xf32> -> vector<40x32xf32>
    %c184 = arith.constant 184 : index
    %c0_34 = arith.constant 0 : index
    %61 = vector.load %arg4[%c184, %c0_34] : memref<192x32xf32, #tpu.memory_space<vmem>>, vector<1x32xf32>
    %62 = vector.broadcast %61 : vector<1x32xf32> to vector<40x32xf32>
    %63 = arith.addf %60, %62 : vector<40x32xf32>
    %c0_35 = arith.constant 0 : index
    %c0_36 = arith.constant 0 : index
    %64 = vector.load %arg6[%c0_35, %c0_36] : memref<141x32xf32, #tpu.memory_space<vmem>>, vector<40x32xf32>
    tpu.vector_store %arg6[%c0_35, %c0_36], %63 {strides = array<i32>} : memref<141x32xf32, #tpu.memory_space<vmem>>, vector<40x32xf32>,
    %c40_37 = arith.constant 40 : index
    %c0_38 = arith.constant 0 : index
    %65 = vector.load %arg6[%c40_37, %c0_38] : memref<141x32xf32, #tpu.memory_space<vmem>>, vector<40x32xf32>
    tpu.vector_store %arg6[%c40_37, %c0_38], %10 {strides = array<i32>} : memref<141x32xf32, #tpu.memory_space<vmem>>, vector<40x32xf32>,
    %c80_39 = arith.constant 80 : index
    %c0_40 = arith.constant 0 : index
    %66 = vector.load %arg6[%c80_39, %c0_40] : memref<141x32xf32, #tpu.memory_space<vmem>>, vector<40x32xf32>
    tpu.vector_store %arg6[%c80_39, %c0_40], %12 {strides = array<i32>} : memref<141x32xf32, #tpu.memory_space<vmem>>, vector<40x32xf32>,
    %c120_41 = arith.constant 120 : index
    %c0_42 = arith.constant 0 : index
    %67 = vector.load %arg6[%c120_41, %c0_42] : memref<141x32xf32, #tpu.memory_space<vmem>>, vector<10x32xf32>
    tpu.vector_store %arg6[%c120_41, %c0_42], %51 {strides = array<i32>} : memref<141x32xf32, #tpu.memory_space<vmem>>, vector<10x32xf32>,
    %c136_43 = arith.constant 136 : index
    %c0_44 = arith.constant 0 : index
    %68 = vector.load %arg6[%c136_43, %c0_44] : memref<141x32xf32, #tpu.memory_space<vmem>>, vector<5x32xf32>
    tpu.vector_store %arg6[%c136_43, %c0_44], %58 {strides = array<i32>} : memref<141x32xf32, #tpu.memory_space<vmem>>, vector<5x32xf32>,
    return
  }
  func.func @transform_0(%arg0: i32) -> (i32, i32) {
    %c0_i32 = arith.constant 0 : i32
    %c0_i32_0 = arith.constant 0 : i32
    %c0_i32_1 = arith.constant 0 : i32
    return %c0_i32, %c0_i32_0 : i32, i32
  }
  func.func @transform_1(%arg0: i32) -> (i32, i32) {
    %c0_i32 = arith.constant 0 : i32
    %c0_i32_0 = arith.constant 0 : i32
    %c0_i32_1 = arith.constant 0 : i32
    return %c0_i32, %c0_i32_0 : i32, i32
  }
  func.func @transform_2(%arg0: i32) -> (i32, i32) {
    %c0_i32 = arith.constant 0 : i32
    %c0_i32_0 = arith.constant 0 : i32
    %c0_i32_1 = arith.constant 0 : i32
    return %c0_i32, %c0_i32_0 : i32, i32
  }
  func.func @transform_3(%arg0: i32) -> (i32, i32) {
    %c0_i32 = arith.constant 0 : i32
    %c0_i32_0 = arith.constant 0 : i32
    %c0_i32_1 = arith.constant 0 : i32
    return %c0_i32, %c0_i32_0 : i32, i32
  }
  func.func @transform_4(%arg0: i32) -> (i32, i32) {
    %c0_i32 = arith.constant 0 : i32
    %c0_i32_0 = arith.constant 0 : i32
    %c0_i32_1 = arith.constant 0 : i32
    return %c0_i32, %c0_i32_0 : i32, i32
  }
  func.func @transform_5(%arg0: i32) -> (i32, i32) {
    %c0_i32 = arith.constant 0 : i32
    %c0_i32_0 = arith.constant 0 : i32
    %c0_i32_1 = arith.constant 0 : i32
    return %c0_i32, %c0_i32_0 : i32, i32
  }
}

</mosaic_0001>

<bundles_post_ra>
// kernel: forward.1
= control target key start
LH: loop header
LB: loop body
LE: loop exit
PB: predicated region body
PF: predicated region fallthrough
CT: control target
= control target key end

     0   :  { %v1887_v0 = vmov 0.0   ;;  %vm1888_vm0 = vmmov 0   ;;  %vm36_vm1 = vcmask 64512   ;;  %v1889_v5 = vmov 0.0|0.0   ;;  %s2458_s3 = inlined_call_operand.vmem [shape: f32[192,32], index: 3, kind: input, shape index: {}]   ;;  %s2459_s0 = inlined_call_operand.vmem [shape: s32[40,8], index: 0, kind: input, shape index: {}]   ;;  %s2460_s1 = inlined_call_operand.vmem [shape: f32[95,32], index: 1, kind: input, shape index: {}]   ;;  %s2461_s5 = inlined_call_operand.vmem [shape: f32[141,32], index: 5, kind: output, shape index: {}]   ;;  %s2462_s2 = inlined_call_operand.vmem [shape: f32[40,80], index: 2, kind: input, shape index: {}]   ;;  %s2463_s4 = inlined_call_operand.vmem [shape: f32[141,50], index: 4, kind: input, shape index: {}]  }
   0x1   :  { %1500 = vmatprep.subr.mxu0 %v1887_v0  ;;  %v30_v1 = vld [vmem:[%s2458_s3] sm:$0xff]  ;;  %1502 = vmatprep.mubr.msk.f32.mxu0 %vm1888_vm0, %v1887_v0  ;;  %v21_v3 = vld [vmem:[%s2459_s0 + $0x8] sm:$0xff]  ;;  %v142_v6 = vld [vmem:[%s2458_s3 + $0x10] sm:$0xff]  ;;  %vm146_vm2 = vcmask 261120   ;;  %vm590_vm4 = vcmask 654336   ;;  %vm827_vm5 = vcmask 1041408  }
   0x2   :  { %v20_v2 = vld [vmem:[%s2459_s0] sm:$0xff]  ;;  %1501 = vmatpush3.msra.mxu0 %v30_v1  ;;  %1848 = vmatprep.subr.bf16.mxu1 %v1889_v5  ;;  %v143_v7 = vld [vmem:[%s2458_s3 + $0x18] sm:$0xff]  ;;  %v26_v8 = vcvt.s32.f32 %v21_v3  ;;  %v22_v10 = vld [vmem:[%s2459_s0 + $0x10] sm:$0xff]  ;;  %vm775_vm6 = vcmask 408576   ;;  %vm1032_vm7 = vcmask 326656   ;;  %vm1315_vm8 = vcmask 254976  }
   0x3   :  { %v25_v4 = vcvt.s32.f32 %v20_v2  ;;  %1768 = vmatprep.subr.bf16.mxu0 %v1889_v5  ;;  %1531 = vmatprep.mubr.msk.f32.mxu1 %vm1888_vm0, %v1887_v0  ;;  %v1769_v9 = vpack.c.bf16 %v143_v7, %v142_v6  ;;  %v27_v11 = vcvt.s32.f32 %v22_v10  ;;  %v23_v12 = vld [vmem:[%s2459_s0 + $0x18] sm:$0xff]  ;;  %v24_v14 = vld [vmem:[%s2459_s0 + $0x20] sm:$0xff]  ;;  %v145_v17 = vld [vmem:[%s2458_s3 + $0x28] sm:$0xff]  ;;  %vm1317_vm9 = vcmask 258048  }
   0x4   :  { %v28_v13 = vcvt.s32.f32 %v23_v12  ;;  %v29_v15 = vcvt.s32.f32 %v24_v14  ;;  %v144_v16 = vld [vmem:[%s2458_s3 + $0x20] sm:$0xff]  ;;  %v252_v19 = vld [vmem:[%s2458_s3 + $0x30] sm:$0xff]  ;;  %v253_v20 = vld [vmem:[%s2458_s3 + $0x38] sm:$0xff] }
   0x5   :  { %1503 = vmatmul.mubr.msk.f32.vlgmr.msra.gmra.mrb[0].mxu0 %vm36_vm1, %v25_v4  ;;  %1850 = vmatpush3.bf16.msra.mxu1 %v1769_v9  ;;  %v1772_v18 = vpack.c.bf16 %v145_v17, %v144_v16  ;;  %v1323_v21 = vld [vmem:[%s2458_s3 + $0x8] ss:$0 sm:$0xff]  ;;  %v1775_v23 = vpack.c.bf16 %v253_v20, %v252_v19  ;;  %v254_v26 = vld [vmem:[%s2458_s3 + $0x40] sm:$0xff]  ;;  %v346_v32 = vld [vmem:[%s2458_s3 + $0x50] sm:$0xff] }
   0x6   :  { %1505 = vmatprep.mubr.msk.f32.mxu0 %vm1888_vm0, %v1887_v0  ;;  %1770 = vmatpush3.bf16.msra.mxu0 %v1769_v9  ;;  %v255_v27 = vld [vmem:[%s2458_s3 + $0x48] sm:$0xff]  ;;  %v347_v33 = vld [vmem:[%s2458_s3 + $0x58] sm:$0xff]  ;;  %v348_v38 = vld [vmem:[%s2458_s3 + $0x60] sm:$0xff] }
   0x7   :  { %1771 = vmatprep.subr.bf16.mxu0 %v1889_v5  ;;  %1849 = vmatprep.subr.bf16.mxu1 %v1889_v5  ;;  %v1778_v29 = vpack.c.bf16 %v255_v27, %v254_v26  ;;  %v1781_v37 = vpack.c.bf16 %v347_v33, %v346_v32  ;;  %v349_v39 = vld [vmem:[%s2458_s3 + $0x68] sm:$0xff]  ;;  %v440_v40 = vld [vmem:[%s2460_s1] sm:$0xff]  ;;  %vm2038_vm3 = vmpackc.low %vm146_vm2, %vm146_vm2 }
   0x8   :  { %v441_v41 = vld [vmem:[%s2460_s1 + $0x8] sm:$0xff]  ;;  %v1784_v45 = vpack.c.bf16 %v349_v39, %v348_v38  ;;  %v442_v51 = vld [vmem:[%s2460_s1 + $0x10] sm:$0xff]  ;;  %v443_v52 = vld [vmem:[%s2460_s1 + $0x18] sm:$0xff] }
   0x9   :  { %1506 = vmatmul.mubr.msk.f32.gmra.mrb[2].mxu0 %vm36_vm1, %v26_v8  ;;  %1851 = vmatpush3.bf16.msra.mxu1 %v1772_v18  ;;  %v1787_v46 = vpack.c.bf16 %v441_v41, %v440_v40  ;;  %v1791_v53 = vpack.c.bf16 %v443_v52, %v442_v51  ;;  %v445_v54 = vld [vmem:[%s2460_s1 + $0x28] sm:$0xff]  ;;  %v446_v55 = vld [vmem:[%s2460_s1 + $0x30] sm:$0xff]  ;;  %v447_v57 = vld [vmem:[%s2460_s1 + $0x38] sm:$0xff] }
   0xa   :  { %1508 = vmatprep.mubr.msk.f32.mxu0 %vm1888_vm0, %v1887_v0  ;;  %1773 = vmatpush3.bf16.msra.mxu0 %v1772_v18  ;;  %v1807_v56 = vpack.c.bf16 %v446_v55, %v445_v54  ;;  %v448_v58 = vld [vmem:[%s2460_s1 + $0x40] sm:$0xff]  ;;  %v449_v17 = vld [vmem:[%s2460_s1 + $0x48] sm:$0xff]  ;;  %v453_v55 = vld [vmem:[%s2462_s2 + $0x18] sm:$0xff] }
   0xb   :  { %1774 = vmatprep.subr.bf16.mxu0 %v1889_v5  ;;  %1780 = vmatprep.subr.bf16.mxu1 %v1889_v5  ;;  %v1810_v59 = vpack.c.bf16 %v448_v58, %v447_v57  ;;  %v444_v1 = vld [vmem:[%s2460_s1 + $0x20] sm:$0xff] }
   0xc   :  { %v450_v39 = vld [vmem:[%s2462_s2] sm:$0xff] }
   0xd   :  { %1509 = vmatmul.mubr.msk.f32.gmra.mrb[4].mxu0 %vm36_vm1, %v27_v11 }
   0xe   :  { %1511 = vmatprep.mubr.msk.f32.mxu0 %vm1888_vm0, %v1887_v0 }
  0x11   :  { %1512 = vmatmul.mubr.msk.f32.gmra.mrb[6].mxu0 %vm36_vm1, %v28_v13 }
  0x12   :  { %1514 = vmatprep.mubr.msk.f32.mxu0 %vm1888_vm0, %v1887_v0 }
  0x15   :  { %1515 = vmatmul.mubr.msk.f32.gmra.mrb[8].mxu0 %vm36_vm1, %v29_v15 }
  0x16   :  { %1525 = vmatprep.mubr.msk.f32.mxu0 %vm1888_vm0, %v1887_v0 }
  0xd8   :  { %v118_v22 = vpop.f32.mrb[0].mxu0 }
  0xd9   :  { %v1985_v24 = vadd.f32 %v1323_v21, %v118_v22  ;;  %v1504_v25 = vpop.f32.mrb[1].mxu0 }
  0xdb   :  { %1526 = vmatmul.mubr.msk.f32.vlgmr.msra.gmra.mrb[10].mxu0 %vm146_vm2, %v1985_v24 }
  0xdc   :  { %v123_v28 = vpop.f32.mrb[2].mxu0  ;;  %1776 = vmatpush3.bf16.msra.mxu0 %v1775_v23  ;;  %1528 = vmatprep.mubr.msk.f32.mxu0 %vm1888_vm0, %v1887_v0 }
  0xdd   :  { %v1997_v30 = vadd.f32 %v1323_v21, %v123_v28  ;;  %v1507_v31 = vpop.f32.mrb[3].mxu0  ;;  %1777 = vmatprep.subr.bf16.mxu0 %v1889_v5 }
  0xdf   :  { %1529 = vmatmul.mubr.msk.f32.gmra.mrb[12].mxu0 %vm146_vm2, %v1997_v30 }
  0xe0   :  { %v128_v34 = vpop.f32.mrb[4].mxu0  ;;  %1779 = vmatpush3.bf16.msra.mxu0 %v1778_v29  ;;  %1548 = vmatprep.mubr.msk.f32.mxu0 %vm1888_vm0, %v1887_v0 }
  0xe1   :  { %v2010_v35 = vadd.f32 %v1323_v21, %v128_v34  ;;  %v1510_v36 = vpop.f32.mrb[5].mxu0  ;;  %1786 = vmatprep.subr.bf16.mxu0 %v1889_v5 }
  0xe3   :  { %1532 = vmatmul.mubr.msk.f32.vlgmr.msra.gmra.mrb[0].mxu1 %vm146_vm2, %v2010_v35  ;;  %1549 = vmatmul.mubr.msk.f32.vlgmr.msra.gmra.mrb[14].mxu0 %vm146_vm2, %v1985_v24 }
  0xe4   :  { %v133_v42 = vpop.f32.mrb[6].mxu0  ;;  %1534 = vmatprep.mubr.msk.f32.mxu1 %vm1888_vm0, %v1887_v0  ;;  %1551 = vmatprep.mubr.msk.f32.mxu0 %vm1888_vm0, %v1887_v0 }
  0xe5   :  { %v2033_v43 = vadd.f32 %v1323_v21, %v133_v42  ;;  %v1513_v44 = vpop.f32.mrb[7].mxu0  ;;  %1782 = vmatpush3.bf16.msra.mxu1 %v1781_v37 }
  0xe6   :  { %1783 = vmatprep.subr.bf16.mxu1 %v1889_v5  ;;  %v451_v44 = vld [vmem:[%s2462_s2 + $0x8] sm:$0xff] }
  0xe7   :  { %1535 = vmatmul.mubr.msk.f32.gmra.mrb[2].mxu1 %vm146_vm2, %v2033_v43  ;;  %1552 = vmatmul.mubr.msk.f32.gmra.mrb[16].mxu0 %vm146_vm2, %v1997_v30 }
  0xe8   :  { %v138_v48 = vpop.f32.mrb[8].mxu0  ;;  %1537 = vmatprep.mubr.msk.f32.mxu1 %vm1888_vm0, %v1887_v0  ;;  %1554 = vmatprep.mubr.msk.f32.mxu0 %vm1888_vm0, %v1887_v0 }
  0xe9   :  { %v2050_v49 = vadd.f32 %v1323_v21, %v138_v48  ;;  %1785 = vmatpush3.bf16.msra.mxu1 %v1784_v45  ;;  %v1516_v50 = vpop.f32.mrb[9].mxu0  ;;  %1789 = vmatpush3.bf16.xpose.msk.msra.mxu0 %vm2038_vm3, %v1787_v46 }
  0xea   :  { %1790 = vmatprep.subr.bf16.mxu0 %v1889_v5  ;;  %1806 = vmatprep.subr.bf16.mxu1 %v1889_v5  ;;  %v452_v50 = vld [vmem:[%s2462_s2 + $0x10] sm:$0xff] }
  0xeb   :  { %1538 = vmatmul.mubr.msk.f32.gmra.mrb[4].mxu1 %vm146_vm2, %v2050_v49  ;;  %1555 = vmatmul.mubr.msk.f32.gmra.mrb[18].mxu0 %vm146_vm2, %v2010_v35 }
  0xec   :  { %1557 = vmatprep.mubr.msk.f32.mxu0 %vm1888_vm0, %v1887_v0  ;;  %1571 = vmatprep.mubr.msk.f32.mxu1 %vm1888_vm0, %v1887_v0 }
  0xef   :  { %1558 = vmatmul.mubr.msk.f32.gmra.mrb[20].mxu0 %vm146_vm2, %v2033_v43  ;;  %1572 = vmatmul.mubr.msk.f32.vlgmr.msra.gmra.mrb[6].mxu1 %vm146_vm2, %v1985_v24 }
  0xf0   :  { %1560 = vmatprep.mubr.msk.f32.mxu0 %vm1888_vm0, %v1887_v0  ;;  %1574 = vmatprep.mubr.msk.f32.mxu1 %vm1888_vm0, %v1887_v0 }
  0xf1   :  { %1793 = vmatpush3.bf16.xpose.msk.msra.mxu0 %vm2038_vm3, %v1791_v53  ;;  %1808 = vmatpush3.bf16.msra.mxu1 %v1807_v56 }
  0xf2   :  { %1794 = vmatprep.subr.bf16.mxu0 %v1889_v5  ;;  %1809 = vmatprep.subr.bf16.mxu1 %v1889_v5 }
  0xf3   :  { %1561 = vmatmul.mubr.msk.f32.gmra.mrb[22].mxu0 %vm146_vm2, %v2050_v49  ;;  %1575 = vmatmul.mubr.msk.f32.gmra.mrb[8].mxu1 %vm146_vm2, %v1997_v30 }
  0xf4   :  { %1577 = vmatprep.mubr.msk.f32.mxu1 %vm1888_vm0, %v1887_v0  ;;  %1606 = vmatprep.mubr.msk.f32.mxu0 %vm1888_vm0, %v1887_v0 }
  0xf5   :  { %1811 = vmatpush3.bf16.msra.mxu1 %v1810_v59 }
  0xf6   :  { %1812 = vmatprep.subr.bf16.mxu1 %v1889_v5 }
  0xf7   :  { %1578 = vmatmul.mubr.msk.f32.gmra.mrb[10].mxu1 %vm146_vm2, %v2010_v35 }
  0xf8   :  { %1580 = vmatprep.mubr.msk.f32.mxu1 %vm1888_vm0, %v1887_v0 }
  0xfb   :  { %1581 = vmatmul.mubr.msk.f32.gmra.mrb[12].mxu1 %vm146_vm2, %v2033_v43 }
  0xfc   :  { %1583 = vmatprep.mubr.msk.f32.mxu1 %vm1888_vm0, %v1887_v0 }
  0xff   :  { %1584 = vmatmul.mubr.msk.f32.gmra.mrb[14].mxu1 %vm146_vm2, %v2050_v49 }
 0x100   :  { %1641 = vmatprep.mubr.msk.f32.mxu1 %vm1888_vm0, %v1887_v0 }
 0x1ae   :  { %v228_v60 = vpop.f32.mrb[10].mxu0 }
 0x1af   :  { %v1527_v61 = vpop.f32.mrb[11].mxu0 }
 0x1b2   :  { %v233_v62 = vpop.f32.mrb[12].mxu0 }
 0x1b3   :  { %v1530_v63 = vpop.f32.mrb[13].mxu0 }
 0x1b6   :  { %v322_v2 = vpop.f32.mrb[14].mxu0  ;;  %v238_v3 = vpop.f32.mrb[0].mxu1 }
 0x1b7   :  { %v1795_v4 = vpack.c.bf16 %v322_v2, %v444_v1  ;;  %1304 = vst.msk [vmem:[%s2461_s5 + $0x28] sm:$0xff] %vm146_vm2, %v322_v2  ;;  %v1550_v6 = vpop.f32.mrb[15].mxu0  ;;  %v1533_v7 = vpop.f32.mrb[1].mxu1 }
 0x1b9   :  { %1797 = vmatpush3.bf16.xpose.msk.msra.mxu0 %vm2038_vm3, %v1795_v4 }
 0x1ba   :  { %v327_v8 = vpop.f32.mrb[16].mxu0  ;;  %v243_v9 = vpop.f32.mrb[2].mxu1  ;;  %1798 = vmatprep.subr.bf16.mxu0 %v1889_v5 }
 0x1bb   :  { %1305 = vst.msk [vmem:[%s2461_s5 + $0x30] sm:$0xff] %vm146_vm2, %v327_v8  ;;  %v1553_v10 = vpop.f32.mrb[17].mxu0  ;;  %v1536_v11 = vpop.f32.mrb[3].mxu1 }
 0x1be   :  { %v332_v12 = vpop.f32.mrb[18].mxu0  ;;  %v248_v13 = vpop.f32.mrb[4].mxu1 }
 0x1bf   :  { %v1799_v14 = vpack.c.bf16 %v332_v12, %v327_v8  ;;  %1306 = vst.msk [vmem:[%s2461_s5 + $0x38] sm:$0xff] %vm146_vm2, %v332_v12  ;;  %v1556_v15 = vpop.f32.mrb[19].mxu0  ;;  %v1539_v16 = vpop.f32.mrb[5].mxu1 }
 0x1c1   :  { %1801 = vmatpush3.bf16.xpose.msk.msra.mxu0 %vm2038_vm3, %v1799_v14 }
 0x1c2   :  { %v337_v18 = vpop.f32.mrb[20].mxu0  ;;  %v416_v19 = vpop.f32.mrb[6].mxu1  ;;  %1802 = vmatprep.subr.bf16.mxu0 %v1889_v5 }
 0x1c3   :  { %1307 = vst.msk [vmem:[%s2461_s5 + $0x40] sm:$0xff] %vm146_vm2, %v337_v18  ;;  %v1813_v20 = vpack.c.bf16 %v416_v19, %v449_v17  ;;  %1309 = vst.msk [vmem:[%s2461_s5 + $0x50] sm:$0xff] %vm146_vm2, %v416_v19  ;;  %v1559_v21 = vpop.f32.mrb[21].mxu0  ;;  %v1573_v22 = vpop.f32.mrb[7].mxu1 }
 0x1c5   :  { %1814 = vmatpush3.bf16.msra.mxu1 %v1813_v20 }
 0x1c6   :  { %v342_v23 = vpop.f32.mrb[22].mxu0  ;;  %v421_v25 = vpop.f32.mrb[8].mxu1  ;;  %1815 = vmatprep.subr.bf16.mxu1 %v1889_v5 }
 0x1c7   :  { %v1803_v26 = vpack.c.bf16 %v342_v23, %v337_v18  ;;  %1308 = vst.msk [vmem:[%s2461_s5 + $0x48] sm:$0xff] %vm146_vm2, %v342_v23  ;;  %1310 = vst.msk [vmem:[%s2461_s5 + $0x58] sm:$0xff] %vm146_vm2, %v421_v25  ;;  %v1562_v27 = vpop.f32.mrb[23].mxu0  ;;  %v1576_v28 = vpop.f32.mrb[9].mxu1 }
 0x1c9   :  { %1805 = vmatpush3.bf16.xpose.msk.msra.mxu0 %vm2038_vm3, %v1803_v26 }
 0x1ca   :  { %v426_v29 = vpop.f32.mrb[10].mxu1  ;;  %1830 = vmatprep.subr.bf16.mxu0 %v1889_v5 }
 0x1cb   :  { %v1816_v31 = vpack.c.bf16 %v426_v29, %v421_v25  ;;  %1311 = vst.msk [vmem:[%s2461_s5 + $0x60] sm:$0xff] %vm146_vm2, %v426_v29  ;;  %v1579_v32 = vpop.f32.mrb[11].mxu1 }
 0x1cd   :  { %1817 = vmatpush3.bf16.msra.mxu1 %v1816_v31 }
 0x1ce   :  { %v431_v33 = vpop.f32.mrb[12].mxu1  ;;  %1818 = vmatprep.subr.bf16.mxu1 %v1889_v5 }
 0x1cf   :  { %1312 = vst.msk [vmem:[%s2461_s5 + $0x68] sm:$0xff] %vm146_vm2, %v431_v33  ;;  %v1582_v34 = vpop.f32.mrb[13].mxu1 }
 0x1d0   :  { %1607 = vmatmul.mubr.msk.f32.vlgmr.msra.gmra.mrb[24].mxu0 %vm146_vm2, %v228_v60  ;;  %v454_v60 = vld [vmem:[%s2462_s2 + $0x20] sm:$0xff] }
 0x1d1   :  { %1609 = vmatprep.mubr.msk.f32.mxu0 %vm1888_vm0, %v1887_v0 }
 0x1d2   :  { %v436_v36 = vpop.f32.mrb[14].mxu1 }
 0x1d3   :  { %v1819_v37 = vpack.c.bf16 %v436_v36, %v431_v33  ;;  %1313 = vst.msk [vmem:[%s2461_s5 + $0x70] sm:$0xff] %vm146_vm2, %v436_v36  ;;  %v1585_v38 = vpop.f32.mrb[15].mxu1 }
 0x1d4   :  { %1610 = vmatmul.mubr.msk.f32.gmra.mrb[26].mxu0 %vm146_vm2, %v233_v62 }
 0x1d5   :  { %1820 = vmatpush3.bf16.msra.mxu1 %v1819_v37  ;;  %1612 = vmatprep.mubr.msk.f32.mxu0 %vm1888_vm0, %v1887_v0 }
 0x1d6   :  { %1821 = vmatprep.subr.bf16.mxu1 %v1889_v5 }
 0x1d8   :  { %1613 = vmatmul.mubr.msk.f32.gmra.mrb[28].mxu0 %vm146_vm2, %v238_v3 }
 0x1d9   :  { %1615 = vmatprep.mubr.msk.f32.mxu0 %vm1888_vm0, %v1887_v0 }
 0x1dc   :  { %1616 = vmatmul.mubr.msk.f32.gmra.mrb[30].mxu0 %vm146_vm2, %v243_v9 }
 0x1dd   :  { %1618 = vmatprep.mubr.msk.f32.mxu0 %vm1888_vm0, %v1887_v0 }
 0x1e0   :  { %1619 = vmatmul.mubr.msk.f32.gmra.mrb[32].mxu0 %vm146_vm2, %v248_v13 }
 0x1e1   :  { %1731 = vmatprep.mubr.msk.f32.mxu0 %vm1888_vm0, %v1887_v0 }
 0x2a3   :  { %v566_v40 = vpop.f32.mrb[24].mxu0 }
 0x2a4   :  { %v567_v41 = vadd.f32 %v566_v40, %v450_v39  ;;  %v1608_v42 = vpop.f32.mrb[25].mxu0 }
 0x2a6   :  { %v591_v45 = vsel %vm590_vm4, %v567_v41, -inf }
 0x2a7   :  { %592 = vmax.xlane.f32.xlu0 %v591_v45  ;;  %v571_v46 = vpop.f32.mrb[26].mxu0 }
 0x2a8   :  { %v572_v47 = vadd.f32 %v571_v46, %v451_v44  ;;  %v1611_v48 = vpop.f32.mrb[27].mxu0 }
 0x2aa   :  { %v594_v51 = vsel %vm590_vm4, %v572_v47, -inf }
 0x2ab   :  { %595 = vmax.xlane.f32.xlu0 %v594_v51  ;;  %v576_v52 = vpop.f32.mrb[28].mxu0 }
 0x2ac   :  { %v577_v53 = vadd.f32 %v576_v52, %v452_v50  ;;  %v1614_v54 = vpop.f32.mrb[29].mxu0 }
 0x2ae   :  { %v597_v56 = vsel %vm590_vm4, %v577_v53, -inf }
 0x2af   :  { %598 = vmax.xlane.f32.xlu1 %v597_v56  ;;  %v581_v57 = vpop.f32.mrb[30].mxu0 }
 0x2b0   :  { %v582_v58 = vadd.f32 %v581_v57, %v453_v55  ;;  %v1617_v59 = vpop.f32.mrb[31].mxu0 }
 0x2b2   :  { %v600_v61 = vsel %vm590_vm4, %v582_v58, -inf }
 0x2b3   :  { %601 = vmax.xlane.f32.xlu1 %v600_v61  ;;  %v586_v62 = vpop.f32.mrb[32].mxu0 }
 0x2b4   :  { %v587_v63 = vadd.f32 %v586_v62, %v454_v60  ;;  %v1620_v1 = vpop.f32.mrb[33].mxu0 }
 0x2b6   :  { %v603_v2 = vsel %vm590_vm4, %v587_v63, -inf }
 0x2b7   :  { %604 = vmax.xlane.f32.xlu0 %v603_v2  ;;  %v758_v2 = vld [vmem:[%s2463_s4] sm:$0xff] }
 0x334   :  { %v593_v3 = vpop.xlane.xlu0 %592 }
 0x335   :  { %v606_v4 = vsub.f32 %v567_v41, %v593_v3  ;;  %v760_v3 = vld [vmem:[%s2463_s4 + $0x10] sm:$0xff] }
 0x337   :  { %v611_v6 = vmul.f32 1.442695, %v606_v4  ;;  %v761_v4 = vld [vmem:[%s2463_s4 + $0x18] sm:$0xff] }
 0x338   :  { %v596_v7 = vpop.xlane.xlu0 %595 }
 0x339   :  { %1855 = vpow2.f32 %v611_v6  ;;  %v607_v8 = vsub.f32 %v572_v47, %v596_v7  ;;  %v762_v6 = vld [vmem:[%s2463_s4 + $0x20] sm:$0xff]  ;;  %v763_v7 = vld [vmem:[%s2463_s4 + $0x28] sm:$0xff] }
 0x33b   :  { %v613_v9 = vmul.f32 1.442695, %v607_v8  ;;  %v764_v8 = vld [vmem:[%s2463_s4 + $0x30] sm:$0xff] }
 0x33c   :  { %v599_v10 = vpop.xlane.xlu1 %598 }
 0x33d   :  { %1857 = vpow2.f32 %v613_v9  ;;  %v608_v11 = vsub.f32 %v577_v53, %v599_v10  ;;  %v765_v9 = vld [vmem:[%s2463_s4 + $0x38] sm:$0xff]  ;;  %v766_v10 = vld [vmem:[%s2463_s4 + $0x40] sm:$0xff] }
 0x33f   :  { %v615_v12 = vmul.f32 1.442695, %v608_v11  ;;  %v767_v11 = vld [vmem:[%s2463_s4 + $0x48] sm:$0xff] }
 0x340   :  { %v602_v13 = vpop.xlane.xlu1 %601 }
 0x341   :  { %1859 = vpow2.f32 %v615_v12  ;;  %v609_v14 = vsub.f32 %v582_v58, %v602_v13  ;;  %v768_v12 = vld [vmem:[%s2463_s4 + $0x50] sm:$0xff]  ;;  %v769_v13 = vld [vmem:[%s2463_s4 + $0x58] sm:$0xff] }
 0x343   :  { %v1856_v15 = vpop.eup %1855  ;;  %v617_v16 = vmul.f32 1.442695, %v609_v14  ;;  %v770_v14 = vld [vmem:[%s2463_s4 + $0x60] sm:$0xff] }
 0x344   :  { %1642 = vmatmul.mubr.msk.f32.vlgmr.msra.gmra.mrb[16].mxu1 %vm590_vm4, %v1856_v15  ;;  %v605_v17 = vpop.xlane.xlu0 %604  ;;  %v621_v18 = vsel %vm590_vm4, %v1856_v15, 0.0  ;;  %v771_v15 = vld [vmem:[%s2463_s4 + $0x68] sm:$0xff] }
 0x345   :  { %1861 = vpow2.f32 %v617_v16  ;;  %v610_v19 = vsub.f32 %v587_v63, %v605_v17  ;;  %622 = vadd.xlane.f32.xlu1 %v621_v18  ;;  %1644 = vmatprep.mubr.msk.f32.mxu1 %vm1888_vm0, %v1887_v0  ;;  %v756_v63 = vld [vmem:[%s2460_s1 + $0x50] sm:$0xff] }
 0x346   :  { %v772_v16 = vld [vmem:[%s2463_s4 + $0x70] sm:$0xff] }
 0x347   :  { %v1858_v20 = vpop.eup %1857  ;;  %v619_v21 = vmul.f32 1.442695, %v610_v19 }
 0x348   :  { %1645 = vmatmul.mubr.msk.f32.gmra.mrb[18].mxu1 %vm590_vm4, %v1858_v20  ;;  %v624_v22 = vsel %vm590_vm4, %v1858_v20, 0.0 }
 0x349   :  { %1863 = vpow2.f32 %v619_v21  ;;  %625 = vadd.xlane.f32.xlu0 %v624_v22  ;;  %1647 = vmatprep.mubr.msk.f32.mxu1 %vm1888_vm0, %v1887_v0 }
 0x34b   :  { %v1860_v23 = vpop.eup %1859 }
 0x34c   :  { %1648 = vmatmul.mubr.msk.f32.gmra.mrb[20].mxu1 %vm590_vm4, %v1860_v23  ;;  %v627_v25 = vsel %vm590_vm4, %v1860_v23, 0.0 }
 0x34d   :  { %628 = vadd.xlane.f32.xlu1 %v627_v25  ;;  %1650 = vmatprep.mubr.msk.f32.mxu1 %vm1888_vm0, %v1887_v0 }
 0x34f   :  { %v1862_v26 = vpop.eup %1861 }
 0x350   :  { %1651 = vmatmul.mubr.msk.f32.gmra.mrb[22].mxu1 %vm590_vm4, %v1862_v26  ;;  %v630_v27 = vsel %vm590_vm4, %v1862_v26, 0.0 }
 0x351   :  { %631 = vadd.xlane.f32.xlu0 %v630_v27  ;;  %1653 = vmatprep.mubr.msk.f32.mxu1 %vm1888_vm0, %v1887_v0 }
 0x353   :  { %v1864_v28 = vpop.eup %1863 }
 0x354   :  { %1654 = vmatmul.mubr.msk.f32.gmra.mrb[24].mxu1 %vm590_vm4, %v1864_v28  ;;  %v633_v29 = vsel %vm590_vm4, %v1864_v28, 0.0  ;;  %v1382_v28 = vld [vmem:[%s2458_s3 + $0x70] ss:$0 sm:$0xff] }
 0x355   :  { %634 = vadd.xlane.f32.xlu1 %v633_v29  ;;  %1670 = vmatprep.mubr.msk.f32.mxu1 %vm1888_vm0, %v1887_v0  ;;  %v1383_v29 = vld [vmem:[%s2458_s3 + $0x71] ss:$0 sm:$0xff] }
 0x3d2   :  { %v623_v31 = vpop.xlane.xlu1 %622 }
 0x3d3   :  { %1865 = vrcp.f32 %v623_v31 }
 0x3d6   :  { %v626_v32 = vpop.xlane.xlu0 %625 }
 0x3d7   :  { %1867 = vrcp.f32 %v626_v32 }
 0x3da   :  { %v629_v33 = vpop.xlane.xlu1 %628 }
 0x3db   :  { %1869 = vrcp.f32 %v629_v33 }
 0x3dd   :  { %v1866_v38 = vpop.eup %1865 }
 0x3de   :  { %v632_v34 = vpop.xlane.xlu0 %631 }
 0x3df   :  { %1871 = vrcp.f32 %v632_v34 }
 0x3e1   :  { %v1868_v41 = vpop.eup %1867 }
 0x3e2   :  { %v635_v39 = vpop.xlane.xlu1 %634 }
 0x3e3   :  { %1873 = vrcp.f32 %v635_v39 }
 0x3e5   :  { %v1870_v52 = vpop.eup %1869 }
 0x3e9   :  { %v1872_v54 = vpop.eup %1871 }
 0x3ed   :  { %v1874_v58 = vpop.eup %1873 }
 0x417   :  { %v717_v36 = vpop.f32.mrb[16].mxu1 }
 0x418   :  { %v1643_v37 = vpop.f32.mrb[17].mxu1  ;;  %v742_v40 = vmul.f32 %v1866_v38, %v717_v36 }
 0x41a   :  { %v2229_v46 = vadd.f32 %v742_v40, %v1985_v24 }
 0x41b   :  { %v722_v42 = vpop.f32.mrb[18].mxu1 }
 0x41c   :  { %v744_v44 = vmul.f32 %v1868_v41, %v722_v42  ;;  %v1646_v45 = vpop.f32.mrb[19].mxu1 }
 0x41e   :  { %v2232_v47 = vadd.f32 %v744_v44, %v1997_v30 }
 0x41f   :  { %v727_v48 = vpop.f32.mrb[20].mxu1 }
 0x420   :  { %v1822_v50 = vpack.c.bf16 %v2232_v47, %v2229_v46  ;;  %v1649_v51 = vpop.f32.mrb[21].mxu1  ;;  %v746_v53 = vmul.f32 %v1870_v52, %v727_v48 }
 0x422   :  { %1823 = vmatpush3.bf16.msra.mxu1 %v1822_v50  ;;  %v2238_v24 = vadd.f32 %v746_v53, %v2010_v35 }
 0x423   :  { %v732_v55 = vpop.f32.mrb[22].mxu1  ;;  %1824 = vmatprep.subr.bf16.mxu1 %v1889_v5 }
 0x424   :  { %v748_v56 = vmul.f32 %v1872_v54, %v732_v55  ;;  %v1652_v57 = vpop.f32.mrb[23].mxu1 }
 0x426   :  { %v2241_v30 = vadd.f32 %v748_v56, %v2033_v43  ;;  %v757_v43 = vld [vmem:[%s2460_s1 + $0x58] sm:$0x3] }
 0x427   :  { %v737_v59 = vpop.f32.mrb[24].mxu1 }
 0x428   :  { %v1825_v60 = vpack.c.bf16 %v2241_v30, %v2238_v24  ;;  %v750_v61 = vmul.f32 %v1874_v58, %v737_v59  ;;  %v1655_v62 = vpop.f32.mrb[25].mxu1 }
 0x42a   :  { %v2249_v1 = vadd.f32 %v750_v61, %v2050_v49  ;;  %1826 = vmatpush3.bf16.msra.mxu1 %v1825_v60  ;;  %v759_v49 = vld [vmem:[%s2463_s4 + $0x8] sm:$0xff]  ;;  %v1384_v60 = vld [vmem:[%s2458_s3 + $0x72] ss:$0 sm:$0xff] }
 0x42b   :  { %1827 = vmatprep.subr.bf16.mxu1 %v1889_v5 }
 0x42c   :  { %v1828_v35 = vpack.c.bf16 %v756_v63, %v2249_v1 }
 0x42e   :  { %1829 = vmatpush3.bf16.msra.mxu1 %v1828_v35 }
 0x42f   :  { %1668 = vmatprep.subr.mxu1 %v1887_v0 }
 0x432   :  { %1669 = vmatpush3.msk.msra.mxu1 %vm827_vm5, %v757_v43 }
 0x433   :  { %1671 = vmatmul.mubr.msk.f32.vlgmr.msra.gmra.mrb[26].mxu1 %vm775_vm6, %v758_v2 }
 0x434   :  { %1673 = vmatprep.mubr.msk.f32.mxu1 %vm1888_vm0, %v1887_v0 }
 0x437   :  { %1674 = vmatmul.mubr.msk.f32.gmra.mrb[28].mxu1 %vm775_vm6, %v759_v49 }
 0x438   :  { %1676 = vmatprep.mubr.msk.f32.mxu1 %vm1888_vm0, %v1887_v0 }
 0x43b   :  { %1677 = vmatmul.mubr.msk.f32.gmra.mrb[30].mxu1 %vm775_vm6, %v760_v3 }
 0x43c   :  { %1679 = vmatprep.mubr.msk.f32.mxu1 %vm1888_vm0, %v1887_v0 }
 0x43f   :  { %1680 = vmatmul.mubr.msk.f32.gmra.mrb[32].mxu1 %vm775_vm6, %v761_v4 }
 0x440   :  { %1682 = vmatprep.mubr.msk.f32.mxu1 %vm1888_vm0, %v1887_v0 }
 0x443   :  { %1683 = vmatmul.mubr.msk.f32.gmra.mrb[34].mxu1 %vm775_vm6, %v762_v6 }
 0x444   :  { %1685 = vmatprep.mubr.msk.f32.mxu1 %vm1888_vm0, %v1887_v0 }
 0x447   :  { %1686 = vmatmul.mubr.msk.f32.gmra.mrb[36].mxu1 %vm775_vm6, %v763_v7 }
 0x448   :  { %1688 = vmatprep.mubr.msk.f32.mxu1 %vm1888_vm0, %v1887_v0 }
 0x44b   :  { %1689 = vmatmul.mubr.msk.f32.gmra.mrb[38].mxu1 %vm775_vm6, %v764_v8 }
 0x44c   :  { %1691 = vmatprep.mubr.msk.f32.mxu1 %vm1888_vm0, %v1887_v0 }
 0x44f   :  { %1692 = vmatmul.mubr.msk.f32.gmra.mrb[40].mxu1 %vm775_vm6, %v765_v9 }
 0x450   :  { %1694 = vmatprep.mubr.msk.f32.mxu1 %vm1888_vm0, %v1887_v0 }
 0x453   :  { %1695 = vmatmul.mubr.msk.f32.gmra.mrb[42].mxu1 %vm775_vm6, %v766_v10 }
 0x454   :  { %1697 = vmatprep.mubr.msk.f32.mxu1 %vm1888_vm0, %v1887_v0 }
 0x457   :  { %1698 = vmatmul.mubr.msk.f32.gmra.mrb[44].mxu1 %vm775_vm6, %v767_v11 }
 0x458   :  { %1700 = vmatprep.mubr.msk.f32.mxu1 %vm1888_vm0, %v1887_v0 }
 0x45b   :  { %1701 = vmatmul.mubr.msk.f32.gmra.mrb[46].mxu1 %vm775_vm6, %v768_v12 }
 0x45c   :  { %1703 = vmatprep.mubr.msk.f32.mxu1 %vm1888_vm0, %v1887_v0 }
 0x45f   :  { %1704 = vmatmul.mubr.msk.f32.gmra.mrb[48].mxu1 %vm775_vm6, %v769_v13 }
 0x460   :  { %1706 = vmatprep.mubr.msk.f32.mxu1 %vm1888_vm0, %v1887_v0 }
 0x463   :  { %1707 = vmatmul.mubr.msk.f32.gmra.mrb[50].mxu1 %vm775_vm6, %v770_v14 }
 0x464   :  { %1709 = vmatprep.mubr.msk.f32.mxu1 %vm1888_vm0, %v1887_v0 }
 0x467   :  { %1710 = vmatmul.mubr.msk.f32.gmra.mrb[52].mxu1 %vm775_vm6, %v771_v15 }
 0x468   :  { %1712 = vmatprep.mubr.msk.f32.mxu1 %vm1888_vm0, %v1887_v0 }
 0x46b   :  { %1713 = vmatmul.mubr.msk.f32.gmra.mrb[54].mxu1 %vm775_vm6, %v772_v16 }
 0x46c   :  { %1715 = vmatprep.mubr.msk.f32.mxu1 %vm1888_vm0, %v1887_v0 }
 0x506   :  { %v897_v17 = vpop.f32.mrb[26].mxu1 }
 0x507   :  { %v1672_v18 = vpop.f32.mrb[27].mxu1  ;;  %v986_v32 = vmul.f32 %v1382_v28, %v897_v17 }
 0x50a   :  { %v902_v19 = vpop.f32.mrb[28].mxu1 }
 0x50b   :  { %v1675_v20 = vpop.f32.mrb[29].mxu1  ;;  %v987_v38 = vmul.f32 %v1382_v28, %v902_v19 }
 0x50e   :  { %v907_v21 = vpop.f32.mrb[30].mxu1 }
 0x50f   :  { %v1678_v22 = vpop.f32.mrb[31].mxu1  ;;  %v988_v44 = vmul.f32 %v1382_v28, %v907_v21 }
 0x512   :  { %v912_v23 = vpop.f32.mrb[32].mxu1 }
 0x513   :  { %v1681_v25 = vpop.f32.mrb[33].mxu1  ;;  %v989_v52 = vmul.f32 %v1382_v28, %v912_v23 }
 0x516   :  { %v917_v26 = vpop.f32.mrb[34].mxu1 }
 0x517   :  { %v1684_v27 = vpop.f32.mrb[35].mxu1  ;;  %v990_v57 = vmul.f32 %v1382_v28, %v917_v26 }
 0x51a   :  { %v922_v31 = vpop.f32.mrb[36].mxu1 }
 0x51b   :  { %v996_v33 = vmul.f32 %v1383_v29, %v922_v31  ;;  %v1687_v34 = vpop.f32.mrb[37].mxu1  ;;  %v1107_v31 = vld [vmem:[%s2458_s3 + $0x78] sm:$0xff] }
 0x51c   :  { %v773_v34 = vld [vmem:[%s2463_s4 + $0x78] sm:$0xff] }
 0x51d   :  { %v1001_v36 = vadd.f32 %v996_v33, %v986_v32  ;;  %v1109_v32 = vld [vmem:[%s2458_s3 + $0x88] sm:$0xff]  ;;  %v1110_v33 = vld [vmem:[%s2458_s3 + $0x90] sm:$0xff]  ;;  %1716 = vmatmul.mubr.msk.f32.gmra.mrb[56].mxu1 %vm775_vm6, %v773_v34 }
 0x51e   :  { %v927_v37 = vpop.f32.mrb[38].mxu1  ;;  %1718 = vmatprep.mubr.msk.f32.mxu1 %vm1888_vm0, %v1887_v0 }
 0x51f   :  { %v997_v39 = vmul.f32 %v1383_v29, %v927_v37  ;;  %v1690_v40 = vpop.f32.mrb[39].mxu1  ;;  %v1185_v37 = vld [vmem:[%s2458_s3 + $0x98] sm:$0xff] }
 0x520   :  { %v1187_v40 = vld [vmem:[%s2458_s3 + $0xa8] sm:$0xff] }
 0x521   :  { %v1002_v41 = vadd.f32 %v997_v39, %v987_v38  ;;  %v1186_v38 = vld [vmem:[%s2458_s3 + $0xa0] sm:$0xff] }
 0x522   :  { %v932_v42 = vpop.f32.mrb[40].mxu1  ;;  %v1843_v39 = vpack.c.bf16 %v1186_v38, %v1185_v37 }
 0x523   :  { %v998_v45 = vmul.f32 %v1383_v29, %v932_v42  ;;  %v1693_v48 = vpop.f32.mrb[41].mxu1 }
 0x525   :  { %v1003_v50 = vadd.f32 %v998_v45, %v988_v44 }
 0x526   :  { %v937_v51 = vpop.f32.mrb[42].mxu1 }
 0x527   :  { %v999_v53 = vmul.f32 %v1383_v29, %v937_v51  ;;  %v1696_v54 = vpop.f32.mrb[43].mxu1 }
 0x529   :  { %v1004_v55 = vadd.f32 %v999_v53, %v989_v52 }
 0x52a   :  { %v942_v56 = vpop.f32.mrb[44].mxu1 }
 0x52b   :  { %v1000_v58 = vmul.f32 %v1383_v29, %v942_v56  ;;  %v1699_v59 = vpop.f32.mrb[45].mxu1 }
 0x52d   :  { %v1005_v61 = vadd.f32 %v1000_v58, %v990_v57 }
 0x52e   :  { %v947_v62 = vpop.f32.mrb[46].mxu1 }
 0x52f   :  { %v1011_v63 = vmul.f32 %v1384_v60, %v947_v62  ;;  %v1702_v35 = vpop.f32.mrb[47].mxu1 }
 0x531   :  { %v1016_v43 = vadd.f32 %v1011_v63, %v1001_v36  ;;  %v774_v36 = vld [vmem:[%s2463_s4 + $0x80] sm:$0x3] }
 0x532   :  { %v952_v2 = vpop.f32.mrb[48].mxu1  ;;  %1719 = vmatmul.mubr.msk.f32.gmra.mrb[58].mxu1 %vm775_vm6, %v774_v36 }
 0x533   :  { %v1012_v49 = vmul.f32 %v1384_v60, %v952_v2  ;;  %v1705_v3 = vpop.f32.mrb[49].mxu1  ;;  %1875 = vtanh.f32 %v1016_v43 }
 0x535   :  { %v1017_v4 = vadd.f32 %v1012_v49, %v1002_v41  ;;  %v1188_v41 = vld [vmem:[%s2458_s3 + $0xb0] sm:$0xff] }
 0x536   :  { %v957_v6 = vpop.f32.mrb[50].mxu1  ;;  %v1846_v45 = vpack.c.bf16 %v1188_v41, %v1187_v40 }
 0x537   :  { %1877 = vtanh.f32 %v1017_v4  ;;  %v1013_v7 = vmul.f32 %v1384_v60, %v957_v6  ;;  %v1708_v8 = vpop.f32.mrb[51].mxu1 }
 0x539   :  { %v1018_v9 = vadd.f32 %v1013_v7, %v1003_v50 }
 0x53a   :  { %v962_v10 = vpop.f32.mrb[52].mxu1 }
 0x53b   :  { %v1014_v11 = vmul.f32 %v1384_v60, %v962_v10  ;;  %v1711_v12 = vpop.f32.mrb[53].mxu1  ;;  %1879 = vtanh.f32 %v1018_v9 }
 0x53d   :  { %v1019_v13 = vadd.f32 %v1014_v11, %v1004_v55  ;;  %v1876_v15 = vpop.eup %1875  ;;  %v1387_v55 = vld [vmem:[%s2458_s3 + $0xb8] ss:$0 sm:$0xff] }
 0x53e   :  { %v967_v14 = vpop.f32.mrb[54].mxu1  ;;  %v1026_v20 = vadd.f32 %v1876_v15, %v2229_v46  ;;  %v1108_v46 = vld [vmem:[%s2458_s3 + $0x80] sm:$0xff] }
 0x53f   :  { %1881 = vtanh.f32 %v1019_v13  ;;  %v1015_v16 = vmul.f32 %v1384_v60, %v967_v14  ;;  %v1714_v17 = vpop.f32.mrb[55].mxu1 }
 0x541   :  { %v1878_v18 = vpop.eup %1877  ;;  %v1020_v19 = vadd.f32 %v1015_v16, %v1005_v61 }
 0x542   :  { %v1027_v21 = vadd.f32 %v1878_v18, %v2232_v47 }
 0x543   :  { %1883 = vtanh.f32 %v1020_v19 }
 0x544   :  { %v1831_v22 = vpack.c.bf16 %v1027_v21, %v1026_v20 }
 0x545   :  { %v1880_v23 = vpop.eup %1879 }
 0x546   :  { %1832 = vmatpush3.bf16.msra.mxu0 %v1831_v22  ;;  %v1028_v26 = vadd.f32 %v1880_v23, %v2238_v24  ;;  %v1031_v24 = vld [vmem:[%s2463_s4 + $0x88] sm:$0x1f] }
 0x547   :  { %1833 = vmatprep.subr.bf16.mxu0 %v1889_v5 }
 0x549   :  { %v1882_v25 = vpop.eup %1881 }
 0x54a   :  { %v1029_v27 = vadd.f32 %v1882_v25, %v2241_v30  ;;  %v1837_v30 = vpack.c.bf16 %v1108_v46, %v1107_v31 }
 0x54c   :  { %v1834_v28 = vpack.c.bf16 %v1029_v27, %v1028_v26 }
 0x54d   :  { %v1884_v29 = vpop.eup %1883 }
 0x54e   :  { %1835 = vmatpush3.bf16.msra.mxu0 %v1834_v28  ;;  %v1030_v47 = vadd.f32 %v1884_v29, %v2249_v1  ;;  %v1840_v1 = vpack.c.bf16 %v1110_v33, %v1109_v32 }
 0x54f   :  { %1729 = vmatprep.subr.mxu0 %v1887_v0 }
 0x552   :  { %1730 = vmatpush3.msra.mxu0 %v1030_v47 }
 0x553   :  { %1732 = vmatmul.mubr.msk.f32.vlgmr.msra.gmra.mrb[34].mxu0 %vm1032_vm7, %v1031_v24  ;;  %1836 = vmatprep.subr.bf16.mxu0 %v1889_v5 }
 0x554   :  { %1838 = vmatpush3.bf16.msra.mxu0 %v1837_v30  ;;  %1742 = vmatprep.mubr.msk.f32.mxu0 %vm1888_vm0, %v1887_v0 }
 0x555   :  { %1839 = vmatprep.subr.bf16.mxu0 %v1889_v5 }
 0x558   :  { %1841 = vmatpush3.bf16.msra.mxu0 %v1840_v1 }
 0x559   :  { %1842 = vmatprep.subr.bf16.mxu0 %v1889_v5 }
 0x626   :  { %v1102_v42 = vpop.f32.mrb[34].mxu0 }
 0x627   :  { %1743 = vmatmul.mubr.msk.f32.vlgmr.msra.gmra.mrb[36].mxu0 %vm146_vm2, %v1102_v42  ;;  %v1733_v44 = vpop.f32.mrb[35].mxu0 }
 0x628   :  { %1844 = vmatpush3.bf16.msra.mxu0 %v1843_v39  ;;  %1753 = vmatprep.mubr.msk.f32.mxu0 %vm1888_vm0, %v1887_v0 }
 0x629   :  { %1845 = vmatprep.subr.bf16.mxu0 %v1889_v5  ;;  %v972_v5 = vpop.f32.mrb[56].mxu1 }
 0x62a   :  { %1314 = vst.msk [vmem:[%s2461_s5 + $0x78] sm:$0xff] %vm146_vm2, %v972_v5  ;;  %v1717_v48 = vpop.f32.mrb[57].mxu1 }
 0x62b   :  { %v977_v50 = vpop.f32.mrb[58].mxu1 }
 0x62c   :  { %1847 = vmatpush3.bf16.msra.mxu0 %v1846_v45  ;;  %v1720_v51 = vpop.f32.mrb[59].mxu1  ;;  %1316 = vst.msk [vmem:[%s2461_s5 + $0x80] sm:$0x3] %vm1315_vm8, %v977_v50 }
 0x62f   :  { %1754 = vmatmul.mubr.msk.f32.vlgmr.msra.gmra.mrb[38].mxu0 %vm146_vm2, %v1026_v20 }
 0x630   :  { %1756 = vmatprep.mubr.msk.f32.mxu0 %vm1888_vm0, %v1887_v0 }
 0x633   :  { %1757 = vmatmul.mubr.msk.f32.gmra.mrb[40].mxu0 %vm146_vm2, %v1027_v21 }
 0x634   :  { %1759 = vmatprep.mubr.msk.f32.mxu0 %vm1888_vm0, %v1887_v0 }
 0x637   :  { %1760 = vmatmul.mubr.msk.f32.gmra.mrb[42].mxu0 %vm146_vm2, %v1028_v26 }
 0x638   :  { %1762 = vmatprep.mubr.msk.f32.mxu0 %vm1888_vm0, %v1887_v0 }
 0x63b   :  { %1763 = vmatmul.mubr.msk.f32.gmra.mrb[44].mxu0 %vm146_vm2, %v1029_v27 }
 0x63c   :  { %1765 = vmatprep.mubr.msk.f32.mxu0 %vm1888_vm0, %v1887_v0  ;;  %v1106_v0 = vld [vmem:[%s2460_s1 + $0x5a] sm:$0x1f] }
 0x63f   :  { %1766 = vmatmul.mubr.msk.f32.gmra.mrb[46].mxu0 %vm146_vm2, %v1030_v47 }
 0x6fa   :  { %v1180_v52 = vpop.f32.mrb[36].mxu0 }
 0x6fb   :  { %v1181_v53 = vadd.f32 %v1180_v52, %v1106_v0  ;;  %v1744_v54 = vpop.f32.mrb[37].mxu0 }
 0x6fd   :  { %1885 = vtanh.f32 %v1181_v53 }
 0x702   :  { %v1275_v56 = vpop.f32.mrb[38].mxu0 }
 0x703   :  { %v1276_v57 = vadd.f32 %v1387_v55, %v1275_v56  ;;  %v1755_v58 = vpop.f32.mrb[39].mxu0 }
 0x705   :  { %1299 = vst.msk [vmem:[%s2461_s5] sm:$0xff] %vm146_vm2, %v1276_v57 }
 0x706   :  { %v1280_v59 = vpop.f32.mrb[40].mxu0 }
 0x707   :  { %v1886_v60 = vpop.eup %1885  ;;  %v1281_v61 = vadd.f32 %v1387_v55, %v1280_v59  ;;  %v1758_v62 = vpop.f32.mrb[41].mxu0 }
 0x708   :  { %1318 = vst.msk [vmem:[%s2461_s5 + $0x88] sm:$0x1f] %vm1317_vm9, %v1886_v60 }
 0x709   :  { %1300 = vst.msk [vmem:[%s2461_s5 + $0x8] sm:$0xff] %vm146_vm2, %v1281_v61 }
 0x70a   :  { %v1285_v63 = vpop.f32.mrb[42].mxu0 }
 0x70b   :  { %v1286_v35 = vadd.f32 %v1387_v55, %v1285_v63  ;;  %v1761_v43 = vpop.f32.mrb[43].mxu0 }
 0x70d   :  { %1301 = vst.msk [vmem:[%s2461_s5 + $0x10] sm:$0xff] %vm146_vm2, %v1286_v35 }
 0x70e   :  { %v1290_v2 = vpop.f32.mrb[44].mxu0 }
 0x70f   :  { %v1291_v49 = vadd.f32 %v1387_v55, %v1290_v2  ;;  %v1764_v3 = vpop.f32.mrb[45].mxu0 }
 0x711   :  { %1302 = vst.msk [vmem:[%s2461_s5 + $0x18] sm:$0xff] %vm146_vm2, %v1291_v49 }
 0x712   :  { %v1295_v4 = vpop.f32.mrb[46].mxu0 }
 0x713   :  { %v1296_v6 = vadd.f32 %v1387_v55, %v1295_v4  ;;  %v1767_v7 = vpop.f32.mrb[47].mxu0 }
 0x715   :  { %1303 = vst.msk [vmem:[%s2461_s5 + $0x20] sm:$0xff] %vm146_vm2, %v1296_v6 }

</bundles_post_ra>
